<compile_context>
chip_gen: v7x
topology: tpu7x:2x2x1
jax: 0.10.0
libtpu: 0.0.40
codegen_flags: <defaults>
</compile_context>

<pallas_src>
import functools
from math import sqrt

import jax
import jax.numpy as jnp
from jax.experimental import pallas as pl
from jax.experimental.pallas import tpu as pltpu

NEG_INF = -100000.0
LARGE = 1e30
LN_EPS = 1e-5              # PyTorch nn.LayerNorm default
MXU_DTYPE = jnp.bfloat16   # MXU input dtype (accumulation stays f32)


def encoder_layer_kernel(
    x_ref, cap_ref,
    ln1_g_ref, ln1_b_ref,
    wq_ref, bq_ref, wk_ref, bk_ref, wv_ref, bv_ref, wo_ref, bo_ref,
    ln2_g_ref, ln2_b_ref,
    w1_ref, b1_ref, w2_ref, b2_ref,
    out_ref,
    *, n_heads,
):
    x = x_ref[0]          # (n, E) f32 — current batch element
    cap = cap_ref[0]      # (1, n) f32 — +LARGE at attendable keys, NEG_INF at padding

    def layer_norm(h, g, b):
        mu = jnp.mean(h, axis=-1, keepdims=True)
        var = jnp.mean((h - mu) ** 2, axis=-1, keepdims=True)
        return (h - mu) * jax.lax.rsqrt(var + LN_EPS) * g + b

    # ---------------- self attention (pre-norm) ----------------
    h = layer_norm(x, ln1_g_ref[...], ln1_b_ref[...])                    # (n, E) f32
    hb = jnp.broadcast_to(h.astype(MXU_DTYPE), (n_heads,) + h.shape)     # (H, n, E) bf16

    # Per-head projections: (H, n, E) @ (H, E, D) -> (H, n, D), f32 accumulation.
    # 1/sqrt(E) is already folded into wq / bq by the wrapper.
    q = jnp.einsum('hne,hed->hnd', hb, wq_ref[...],
                   preferred_element_type=jnp.float32) + bq_ref[...]
    k = jnp.einsum('hne,hed->hnd', hb, wk_ref[...],
                   preferred_element_type=jnp.float32) + bk_ref[...]
    v = jnp.einsum('hne,hed->hnd', hb, wv_ref[...],
                   preferred_element_type=jnp.float32) + bv_ref[...]

    # Attention scores for all heads at once: (H, n, n) f32.
    s = jnp.einsum('hqd,hkd->hqk', q.astype(MXU_DTYPE), k.astype(MXU_DTYPE),
                   preferred_element_type=jnp.float32)
    # Exact masked_fill semantics via a single min with the per-key cap.
    s = jnp.minimum(s, cap[None])

    # Softmax over the key axis (f32 stats, approx reciprocal on EUP).
    m = jnp.max(s, axis=-1, keepdims=True)
    p = jnp.exp(s - m)
    denom = jnp.sum(p, axis=-1, keepdims=True)
    probs = p * pl.reciprocal(denom, approx=True)

    # Weighted values: (H, n, n) @ (H, n, D) -> (H, n, D).
    pooled = jnp.einsum('hqk,hkd->hqd', probs.astype(MXU_DTYPE), v.astype(MXU_DTYPE),
                        preferred_element_type=jnp.float32)

    # Output projection: per-head (H, n, D) @ (H, D, E) -> (H, n, E), sum over heads
    # (equivalent to concat(heads) @ Wo, without any lane-axis concatenate).
    att = jnp.einsum('hqd,hde->hqe', pooled.astype(MXU_DTYPE), wo_ref[...],
                     preferred_element_type=jnp.float32)
    att = jnp.sum(att, axis=0) + bo_ref[...]
    x = x + att                                   # residual (dropout p=0 -> identity)

    # ---------------- feed forward (pre-norm) ----------------
    h = layer_norm(x, ln2_g_ref[...], ln2_b_ref[...])
    z = jnp.dot(h.astype(MXU_DTYPE), w1_ref[...],
                preferred_element_type=jnp.float32) + b1_ref[...]
    z = jnp.maximum(z, 0.0)
    z = jnp.dot(z.astype(MXU_DTYPE), w2_ref[...],
                preferred_element_type=jnp.float32) + b2_ref[...]
    x = x + z                                     # residual (dropout p=0 -> identity)

    out_ref[0] = x


def encoder_layer(x_nbe, src_mask_nb, params, n_heads):
    """x_nbe: (n, b, E) float32; src_mask_nb: (n, b) with 1.0 at padding positions."""
    n, b, E = x_nbe.shape
    H = n_heads
    D = E // H
    assert E % H == 0

    x = jnp.transpose(x_nbe, (1, 0, 2)).astype(jnp.float32)                    # (b, n, E)
    mask = jnp.transpose(src_mask_nb, (1, 0)).astype(jnp.float32)[:, None, :]  # (b, 1, n)
    # Per-key "cap": +LARGE where attendable, NEG_INF where padded (masked_fill via min).
    cap = jnp.where(mask > 0.5, NEG_INF, LARGE).astype(jnp.float32)

    inv_sqrt_e = 1.0 / sqrt(E)

    def split_heads_w(w):          # (E, E) with y = x @ w  ->  (H, E, D)
        return jnp.transpose(w.reshape(E, H, D), (1, 0, 2))

    def split_heads_b(bias):       # (1, E) -> (H, 1, D)
        return bias.reshape(H, 1, D)

    ordered = (
        params['ln1_g'].astype(jnp.float32), params['ln1_b'].astype(jnp.float32),
        (split_heads_w(params['wq']) * inv_sqrt_e).astype(MXU_DTYPE),
        (split_heads_b(params['bq']) * inv_sqrt_e).astype(jnp.float32),
        split_heads_w(params['wk']).astype(MXU_DTYPE),
        split_heads_b(params['bk']).astype(jnp.float32),
        split_heads_w(params['wv']).astype(MXU_DTYPE),
        split_heads_b(params['bv']).astype(jnp.float32),
        params['wo'].reshape(H, D, E).astype(MXU_DTYPE),
        params['bo'].astype(jnp.float32),
        params['ln2_g'].astype(jnp.float32), params['ln2_b'].astype(jnp.float32),
        params['w1'].astype(MXU_DTYPE), params['b1'].astype(jnp.float32),
        params['w2'].astype(MXU_DTYPE), params['b2'].astype(jnp.float32),
    )

    def resident(a):
        # Full-array block with a constant index_map -> stays VMEM-resident across steps.
        if a.ndim == 2:
            return pl.BlockSpec(a.shape, lambda i: (0, 0))
        return pl.BlockSpec(a.shape, lambda i: (0, 0, 0))

    in_specs = (
        [pl.BlockSpec((1, n, E), lambda i: (i, 0, 0)),
         pl.BlockSpec((1, 1, n), lambda i: (i, 0, 0))]
        + [resident(a) for a in ordered]
    )

    out = pl.pallas_call(
        functools.partial(encoder_layer_kernel, n_heads=H),
        out_shape=jax.ShapeDtypeStruct((b, n, E), jnp.float32),
        grid=(b,),
        in_specs=in_specs,
        out_specs=pl.BlockSpec((1, n, E), lambda i: (i, 0, 0)),
        compiler_params=pltpu.CompilerParams(
            dimension_semantics=("parallel",),
        ),
    )(x, cap, *ordered)
    return jnp.transpose(out, (1, 0, 2))  # back to (n, b, E)


def glorot(key, in_dim, out_dim):
    # PyTorch weight is (out, in) with y = x @ W.T + b; we store W.T = (in, out).
    a = sqrt(6.0 / (in_dim + out_dim))
    return jax.random.uniform(key, (in_dim, out_dim), jnp.float32, -a, a)


def make_params(key, E, H, hidden):
    ks = jax.random.split(key, 6)
    z = lambda d: jnp.zeros((1, d), jnp.float32)
    return dict(
        ln1_g=jnp.ones((1, E), jnp.float32), ln1_b=z(E),
        wq=glorot(ks[0], E, E), bq=z(E),
        wk=glorot(ks[1], E, E), bk=z(E),
        wv=glorot(ks[2], E, E), bv=z(E),
        wo=glorot(ks[3], E, E), bo=z(E),
        ln2_g=jnp.ones((1, E), jnp.float32), ln2_b=z(E),
        w1=glorot(ks[4], E, hidden), b1=z(hidden),
        w2=glorot(ks[5], hidden, E), b2=z(E),
    )


def reference(x, src_mask, params, n_heads):
    """Pure-JAX (f32) mirror of the PyTorch module (x: (n, b, E))."""
    n, b, E = x.shape
    D = E // n_heads

    def ln(h, g, be):
        mu = h.mean(-1, keepdims=True)
        var = ((h - mu) ** 2).mean(-1, keepdims=True)
        return (h - mu) / jnp.sqrt(var + LN_EPS) * g[0] + be[0]

    h = ln(x, params['ln1_g'], params['ln1_b'])
    q = (h @ params['wq'] + params['bq'][0]).reshape(n, b, n_heads, D)
    k = (h @ params['wk'] + params['bk'][0]).reshape(n, b, n_heads, D)
    v = (h @ params['wv'] + params['bv'][0]).reshape(n, b, n_heads, D)
    pot = jnp.einsum('mbhd,nbhd->mnbh', q, k) / sqrt(E)
    pot = jnp.where(src_mask[None, :, :, None] > 0.5, NEG_INF, pot)
    w = jax.nn.softmax(pot, axis=1)
    pooled = jnp.einsum('mnbh,nbhd->mbhd', w, v).reshape(n, b, E)
    x = x + (pooled @ params['wo'] + params['bo'][0])
    h = ln(x, params['ln2_g'], params['ln2_b'])
    h = jnp.maximum(h @ params['w1'] + params['b1'][0], 0.0)
    h = h @ params['w2'] + params['b2'][0]
    return x + h


if __name__ == "__main__":
    n, b, E, heads, hidden = 8, 2, 32, 4, 64
    key = jax.random.PRNGKey(0)
    kx, kp = jax.random.split(key)

    x = jax.random.normal(kx, (n, b, E), jnp.float32)
    # mark last 2 positions of batch 1 as padding
    src_mask = jnp.zeros((n, b), jnp.float32).at[-2:, 1].set(1.0)

    params = make_params(kp, E, heads, hidden)

    out = encoder_layer(x, src_mask, params, heads)
    out = jax.block_until_ready(out)

    ref = reference(x, src_mask, params, heads)
    assert out.shape == (n, b, E)
    # bf16 MXU inputs (f32 accumulation) vs. pure-f32 reference -> loosened tolerance.
    err = float(jnp.max(jnp.abs(out - ref)))
    assert jnp.allclose(out, ref, rtol=5e-2, atol=5e-2), f"max abs err {err}"

    print("KERNEL_OK")
</pallas_src>

<mosaic_0001>
module attributes {stable_mosaic.version = 11 : i64} {
  func.func @encoder_layer_kernel(%arg0: i32, %arg1: memref<1x8x32xf32, #tpu.memory_space<vmem>>, %arg2: memref<1x1x8xf32, #tpu.memory_space<vmem>>, %arg3: memref<1x32xf32, #tpu.memory_space<vmem>>, %arg4: memref<1x32xf32, #tpu.memory_space<vmem>>, %arg5: memref<4x32x8xbf16, #tpu.memory_space<vmem>>, %arg6: memref<4x1x8xf32, #tpu.memory_space<vmem>>, %arg7: memref<4x32x8xbf16, #tpu.memory_space<vmem>>, %arg8: memref<4x1x8xf32, #tpu.memory_space<vmem>>, %arg9: memref<4x32x8xbf16, #tpu.memory_space<vmem>>, %arg10: memref<4x1x8xf32, #tpu.memory_space<vmem>>, %arg11: memref<4x8x32xbf16, #tpu.memory_space<vmem>>, %arg12: memref<1x32xf32, #tpu.memory_space<vmem>>, %arg13: memref<1x32xf32, #tpu.memory_space<vmem>>, %arg14: memref<1x32xf32, #tpu.memory_space<vmem>>, %arg15: memref<32x64xbf16, #tpu.memory_space<vmem>>, %arg16: memref<1x64xf32, #tpu.memory_space<vmem>>, %arg17: memref<64x32xbf16, #tpu.memory_space<vmem>>, %arg18: memref<1x32xf32, #tpu.memory_space<vmem>>, %arg19: memref<1x8x32xf32, #tpu.memory_space<vmem>>) attributes {dimension_semantics = [#tpu.dimension_semantics<parallel>], iteration_bounds = array<i64: 2>, scalar_prefetch = 0 : i64, scratch_operands = 0 : i64, tpu.core_type = #tpu.core_type<tc>, window_params = [{transform_indices = @transform_0, window_bounds = array<i64: 1, 8, 32>}, {transform_indices = @transform_1, window_bounds = array<i64: 1, 1, 8>}, {pipeline_mode = #tpu.pipeline_mode<synchronous>, transform_indices = @transform_2, window_bounds = array<i64: 1, 32>}, {pipeline_mode = #tpu.pipeline_mode<synchronous>, transform_indices = @transform_3, window_bounds = array<i64: 1, 32>}, {pipeline_mode = #tpu.pipeline_mode<synchronous>, transform_indices = @transform_4, window_bounds = array<i64: 4, 32, 8>}, {pipeline_mode = #tpu.pipeline_mode<synchronous>, transform_indices = @transform_5, window_bounds = array<i64: 4, 1, 8>}, {pipeline_mode = #tpu.pipeline_mode<synchronous>, transform_indices = @transform_6, window_bounds = array<i64: 4, 32, 8>}, {pipeline_mode = #tpu.pipeline_mode<synchronous>, transform_indices = @transform_7, window_bounds = array<i64: 4, 1, 8>}, {pipeline_mode = #tpu.pipeline_mode<synchronous>, transform_indices = @transform_8, window_bounds = array<i64: 4, 32, 8>}, {pipeline_mode = #tpu.pipeline_mode<synchronous>, transform_indices = @transform_9, window_bounds = array<i64: 4, 1, 8>}, {pipeline_mode = #tpu.pipeline_mode<synchronous>, transform_indices = @transform_10, window_bounds = array<i64: 4, 8, 32>}, {pipeline_mode = #tpu.pipeline_mode<synchronous>, transform_indices = @transform_11, window_bounds = array<i64: 1, 32>}, {pipeline_mode = #tpu.pipeline_mode<synchronous>, transform_indices = @transform_12, window_bounds = array<i64: 1, 32>}, {pipeline_mode = #tpu.pipeline_mode<synchronous>, transform_indices = @transform_13, window_bounds = array<i64: 1, 32>}, {pipeline_mode = #tpu.pipeline_mode<synchronous>, transform_indices = @transform_14, window_bounds = array<i64: 32, 64>}, {pipeline_mode = #tpu.pipeline_mode<synchronous>, transform_indices = @transform_15, window_bounds = array<i64: 1, 64>}, {pipeline_mode = #tpu.pipeline_mode<synchronous>, transform_indices = @transform_16, window_bounds = array<i64: 64, 32>}, {pipeline_mode = #tpu.pipeline_mode<synchronous>, transform_indices = @transform_17, window_bounds = array<i64: 1, 32>}, {transform_indices = @transform_18, window_bounds = array<i64: 1, 8, 32>}]} {
    %c0 = arith.constant 0 : index
    %c0_0 = arith.constant 0 : index
    %c0_1 = arith.constant 0 : index
    %0 = vector.load %arg1[%c0, %c0_0, %c0_1] : memref<1x8x32xf32, #tpu.memory_space<vmem>>, vector<1x8x32xf32>
    %1 = vector.shape_cast %0 : vector<1x8x32xf32> to vector<8x32xf32>
    %c0_2 = arith.constant 0 : index
    %c0_3 = arith.constant 0 : index
    %c0_4 = arith.constant 0 : index
    %2 = vector.load %arg2[%c0_2, %c0_3, %c0_4] : memref<1x1x8xf32, #tpu.memory_space<vmem>>, vector<1x1x8xf32>
    %3 = vector.shape_cast %2 : vector<1x1x8xf32> to vector<1x8xf32>
    %c0_5 = arith.constant 0 : index
    %c0_6 = arith.constant 0 : index
    %4 = vector.load %arg3[%c0_5, %c0_6] : memref<1x32xf32, #tpu.memory_space<vmem>>, vector<1x32xf32>
    %c0_7 = arith.constant 0 : index
    %c0_8 = arith.constant 0 : index
    %5 = vector.load %arg4[%c0_7, %c0_8] : memref<1x32xf32, #tpu.memory_space<vmem>>, vector<1x32xf32>
    %cst = arith.constant dense<0.000000e+00> : vector<8xf32>
    %6 = vector.multi_reduction <add>, %1, %cst [1] : vector<8x32xf32> to vector<8xf32>
    %7 = vector.shape_cast %6 : vector<8xf32> to vector<8x1xf32>
    %cst_9 = arith.constant 3.200000e+01 : f32
    %8 = vector.broadcast %cst_9 : f32 to vector<8x1xf32>
    %9 = arith.divf %7, %8 : vector<8x1xf32>
    %10 = vector.broadcast %9 : vector<8x1xf32> to vector<8x32xf32>
    %11 = arith.subf %1, %10 : vector<8x32xf32>
    %12 = arith.mulf %11, %11 : vector<8x32xf32>
    %cst_10 = arith.constant dense<0.000000e+00> : vector<8xf32>
    %13 = vector.multi_reduction <add>, %12, %cst_10 [1] : vector<8x32xf32> to vector<8xf32>
    %14 = vector.shape_cast %13 : vector<8xf32> to vector<8x1xf32>
    %cst_11 = arith.constant 3.200000e+01 : f32
    %15 = vector.broadcast %cst_11 : f32 to vector<8x1xf32>
    %16 = arith.divf %14, %15 : vector<8x1xf32>
    %17 = vector.broadcast %9 : vector<8x1xf32> to vector<8x32xf32>
    %18 = arith.subf %1, %17 : vector<8x32xf32>
    %cst_12 = arith.constant 9.99999974E-6 : f32
    %19 = vector.broadcast %cst_12 : f32 to vector<8x1xf32>
    %20 = arith.addf %16, %19 : vector<8x1xf32>
    %21 = math.rsqrt %20 : vector<8x1xf32>
    %22 = vector.broadcast %21 : vector<8x1xf32> to vector<8x32xf32>
    %23 = arith.mulf %18, %22 : vector<8x32xf32>
    %24 = vector.broadcast %4 : vector<1x32xf32> to vector<8x32xf32>
    %25 = arith.mulf %23, %24 : vector<8x32xf32>
    %26 = vector.broadcast %5 : vector<1x32xf32> to vector<8x32xf32>
    %27 = arith.addf %25, %26 : vector<8x32xf32>
    %28 = arith.truncf %27 : vector<8x32xf32> to vector<8x32xbf16>
    %29 = vector.shape_cast %28 : vector<8x32xbf16> to vector<1x8x32xbf16>
    %30 = vector.broadcast %29 : vector<1x8x32xbf16> to vector<4x8x32xbf16>
    %c0_13 = arith.constant 0 : index
    %c0_14 = arith.constant 0 : index
    %c0_15 = arith.constant 0 : index
    %31 = vector.load %arg5[%c0_13, %c0_14, %c0_15] : memref<4x32x8xbf16, #tpu.memory_space<vmem>>, vector<4x32x8xbf16>
    "tpu.trace_start"() <{level = 10 : i32, message = "hne,hed->hnd"}> : () -> ()
    %cst_16 = arith.constant dense<0.000000e+00> : vector<4x8x8xf32>
    %32 = tpu.matmul %30, %31, %cst_16 {dimension_numbers = #tpu.dot_dimension_numbers<[2], [1], [1], [2], [0, 0, 0, 1, 1, 2], [0], [0]>} : vector<4x8x32xbf16>, vector<4x32x8xbf16>, vector<4x8x8xf32> -> vector<4x8x8xf32>
    "tpu.trace_stop"() : () -> ()
    %c0_17 = arith.constant 0 : index
    %c0_18 = arith.constant 0 : index
    %c0_19 = arith.constant 0 : index
    %33 = vector.load %arg6[%c0_17, %c0_18, %c0_19] : memref<4x1x8xf32, #tpu.memory_space<vmem>>, vector<4x1x8xf32>
    %34 = vector.broadcast %33 : vector<4x1x8xf32> to vector<4x8x8xf32>
    %35 = arith.addf %32, %34 : vector<4x8x8xf32>
    %c0_20 = arith.constant 0 : index
    %c0_21 = arith.constant 0 : index
    %c0_22 = arith.constant 0 : index
    %36 = vector.load %arg7[%c0_20, %c0_21, %c0_22] : memref<4x32x8xbf16, #tpu.memory_space<vmem>>, vector<4x32x8xbf16>
    "tpu.trace_start"() <{level = 10 : i32, message = "hne,hed->hnd"}> : () -> ()
    %cst_23 = arith.constant dense<0.000000e+00> : vector<4x8x8xf32>
    %37 = tpu.matmul %30, %36, %cst_23 {dimension_numbers = #tpu.dot_dimension_numbers<[2], [1], [1], [2], [0, 0, 0, 1, 1, 2], [0], [0]>} : vector<4x8x32xbf16>, vector<4x32x8xbf16>, vector<4x8x8xf32> -> vector<4x8x8xf32>
    "tpu.trace_stop"() : () -> ()
    %c0_24 = arith.constant 0 : index
    %c0_25 = arith.constant 0 : index
    %c0_26 = arith.constant 0 : index
    %38 = vector.load %arg8[%c0_24, %c0_25, %c0_26] : memref<4x1x8xf32, #tpu.memory_space<vmem>>, vector<4x1x8xf32>
    %39 = vector.broadcast %38 : vector<4x1x8xf32> to vector<4x8x8xf32>
    %40 = arith.addf %37, %39 : vector<4x8x8xf32>
    %c0_27 = arith.constant 0 : index
    %c0_28 = arith.constant 0 : index
    %c0_29 = arith.constant 0 : index
    %41 = vector.load %arg9[%c0_27, %c0_28, %c0_29] : memref<4x32x8xbf16, #tpu.memory_space<vmem>>, vector<4x32x8xbf16>
    "tpu.trace_start"() <{level = 10 : i32, message = "hne,hed->hnd"}> : () -> ()
    %cst_30 = arith.constant dense<0.000000e+00> : vector<4x8x8xf32>
    %42 = tpu.matmul %30, %41, %cst_30 {dimension_numbers = #tpu.dot_dimension_numbers<[2], [1], [1], [2], [0, 0, 0, 1, 1, 2], [0], [0]>} : vector<4x8x32xbf16>, vector<4x32x8xbf16>, vector<4x8x8xf32> -> vector<4x8x8xf32>
    "tpu.trace_stop"() : () -> ()
    %c0_31 = arith.constant 0 : index
    %c0_32 = arith.constant 0 : index
    %c0_33 = arith.constant 0 : index
    %43 = vector.load %arg10[%c0_31, %c0_32, %c0_33] : memref<4x1x8xf32, #tpu.memory_space<vmem>>, vector<4x1x8xf32>
    %44 = vector.broadcast %43 : vector<4x1x8xf32> to vector<4x8x8xf32>
    %45 = arith.addf %42, %44 : vector<4x8x8xf32>
    %46 = arith.truncf %35 : vector<4x8x8xf32> to vector<4x8x8xbf16>
    %47 = arith.truncf %40 : vector<4x8x8xf32> to vector<4x8x8xbf16>
    "tpu.trace_start"() <{level = 10 : i32, message = "hqd,hkd->hqk"}> : () -> ()
    %cst_34 = arith.constant dense<0.000000e+00> : vector<4x8x8xf32>
    %48 = tpu.matmul %46, %47, %cst_34 {dimension_numbers = #tpu.dot_dimension_numbers<[2], [2], [1], [1], [0, 0, 0, 1, 1, 1], [0], [0]>} : vector<4x8x8xbf16>, vector<4x8x8xbf16>, vector<4x8x8xf32> -> vector<4x8x8xf32>
    "tpu.trace_stop"() : () -> ()
    %49 = vector.shape_cast %3 : vector<1x8xf32> to vector<1x1x8xf32>
    %50 = vector.broadcast %49 : vector<1x1x8xf32> to vector<4x8x8xf32>
    %51 = arith.minimumf %48, %50 : vector<4x8x8xf32>
    %cst_35 = arith.constant dense<0xFF800000> : vector<4x8xf32>
    %52 = vector.multi_reduction <maximumf>, %51, %cst_35 [2] : vector<4x8x8xf32> to vector<4x8xf32>
    %53 = vector.shape_cast %52 : vector<4x8xf32> to vector<4x8x1xf32>
    %54 = vector.broadcast %53 : vector<4x8x1xf32> to vector<4x8x8xf32>
    %55 = arith.subf %51, %54 : vector<4x8x8xf32>
    %56 = math.exp %55 : vector<4x8x8xf32>
    %cst_36 = arith.constant dense<0.000000e+00> : vector<4x8xf32>
    %57 = vector.multi_reduction <add>, %56, %cst_36 [2] : vector<4x8x8xf32> to vector<4x8xf32>
    %58 = vector.shape_cast %57 : vector<4x8xf32> to vector<4x8x1xf32>
    %59 = tpu.reciprocal %58 {approx = true} : vector<4x8x1xf32> -> vector<4x8x1xf32>
    %60 = vector.broadcast %59 : vector<4x8x1xf32> to vector<4x8x8xf32>
    %61 = arith.mulf %56, %60 : vector<4x8x8xf32>
    %62 = arith.truncf %61 : vector<4x8x8xf32> to vector<4x8x8xbf16>
    %63 = arith.truncf %45 : vector<4x8x8xf32> to vector<4x8x8xbf16>
    "tpu.trace_start"() <{level = 10 : i32, message = "hqk,hkd->hqd"}> : () -> ()
    %cst_37 = arith.constant dense<0.000000e+00> : vector<4x8x8xf32>
    %64 = tpu.matmul %62, %63, %cst_37 {dimension_numbers = #tpu.dot_dimension_numbers<[2], [1], [1], [2], [0, 0, 0, 1, 1, 2], [0], [0]>} : vector<4x8x8xbf16>, vector<4x8x8xbf16>, vector<4x8x8xf32> -> vector<4x8x8xf32>
    "tpu.trace_stop"() : () -> ()
    %65 = arith.truncf %64 : vector<4x8x8xf32> to vector<4x8x8xbf16>
    %c0_38 = arith.constant 0 : index
    %c0_39 = arith.constant 0 : index
    %c0_40 = arith.constant 0 : index
    %66 = vector.load %arg11[%c0_38, %c0_39, %c0_40] : memref<4x8x32xbf16, #tpu.memory_space<vmem>>, vector<4x8x32xbf16>
    "tpu.trace_start"() <{level = 10 : i32, message = "hqd,hde->hqe"}> : () -> ()
    %cst_41 = arith.constant dense<0.000000e+00> : vector<4x8x32xf32>
    %67 = tpu.matmul %65, %66, %cst_41 {dimension_numbers = #tpu.dot_dimension_numbers<[2], [1], [1], [2], [0, 0, 0, 1, 1, 2], [0], [0]>} : vector<4x8x8xbf16>, vector<4x8x32xbf16>, vector<4x8x32xf32> -> vector<4x8x32xf32>
    "tpu.trace_stop"() : () -> ()
    %cst_42 = arith.constant dense<0.000000e+00> : vector<8x32xf32>
    %68 = vector.multi_reduction <add>, %67, %cst_42 [0] : vector<4x8x32xf32> to vector<8x32xf32>
    %c0_43 = arith.constant 0 : index
    %c0_44 = arith.constant 0 : index
    %69 = vector.load %arg12[%c0_43, %c0_44] : memref<1x32xf32, #tpu.memory_space<vmem>>, vector<1x32xf32>
    %70 = vector.broadcast %69 : vector<1x32xf32> to vector<8x32xf32>
    %71 = arith.addf %68, %70 : vector<8x32xf32>
    %72 = arith.addf %1, %71 : vector<8x32xf32>
    %c0_45 = arith.constant 0 : index
    %c0_46 = arith.constant 0 : index
    %73 = vector.load %arg13[%c0_45, %c0_46] : memref<1x32xf32, #tpu.memory_space<vmem>>, vector<1x32xf32>
    %c0_47 = arith.constant 0 : index
    %c0_48 = arith.constant 0 : index
    %74 = vector.load %arg14[%c0_47, %c0_48] : memref<1x32xf32, #tpu.memory_space<vmem>>, vector<1x32xf32>
    %cst_49 = arith.constant dense<0.000000e+00> : vector<8xf32>
    %75 = vector.multi_reduction <add>, %72, %cst_49 [1] : vector<8x32xf32> to vector<8xf32>
    %76 = vector.shape_cast %75 : vector<8xf32> to vector<8x1xf32>
    %cst_50 = arith.constant 3.200000e+01 : f32
    %77 = vector.broadcast %cst_50 : f32 to vector<8x1xf32>
    %78 = arith.divf %76, %77 : vector<8x1xf32>
    %79 = vector.broadcast %78 : vector<8x1xf32> to vector<8x32xf32>
    %80 = arith.subf %72, %79 : vector<8x32xf32>
    %81 = arith.mulf %80, %80 : vector<8x32xf32>
    %cst_51 = arith.constant dense<0.000000e+00> : vector<8xf32>
    %82 = vector.multi_reduction <add>, %81, %cst_51 [1] : vector<8x32xf32> to vector<8xf32>
    %83 = vector.shape_cast %82 : vector<8xf32> to vector<8x1xf32>
    %cst_52 = arith.constant 3.200000e+01 : f32
    %84 = vector.broadcast %cst_52 : f32 to vector<8x1xf32>
    %85 = arith.divf %83, %84 : vector<8x1xf32>
    %86 = vector.broadcast %78 : vector<8x1xf32> to vector<8x32xf32>
    %87 = arith.subf %72, %86 : vector<8x32xf32>
    %cst_53 = arith.constant 9.99999974E-6 : f32
    %88 = vector.broadcast %cst_53 : f32 to vector<8x1xf32>
    %89 = arith.addf %85, %88 : vector<8x1xf32>
    %90 = math.rsqrt %89 : vector<8x1xf32>
    %91 = vector.broadcast %90 : vector<8x1xf32> to vector<8x32xf32>
    %92 = arith.mulf %87, %91 : vector<8x32xf32>
    %93 = vector.broadcast %73 : vector<1x32xf32> to vector<8x32xf32>
    %94 = arith.mulf %92, %93 : vector<8x32xf32>
    %95 = vector.broadcast %74 : vector<1x32xf32> to vector<8x32xf32>
    %96 = arith.addf %94, %95 : vector<8x32xf32>
    %97 = arith.truncf %96 : vector<8x32xf32> to vector<8x32xbf16>
    %c0_54 = arith.constant 0 : index
    %c0_55 = arith.constant 0 : index
    %98 = vector.load %arg15[%c0_54, %c0_55] : memref<32x64xbf16, #tpu.memory_space<vmem>>, vector<32x64xbf16>
    %cst_56 = arith.constant dense<0.000000e+00> : vector<8x64xf32>
    %99 = tpu.matmul %97, %98, %cst_56 {dimension_numbers = #tpu.dot_dimension_numbers<[1], [0], [0], [1], [0, 0, 1, 1], [], []>} : vector<8x32xbf16>, vector<32x64xbf16>, vector<8x64xf32> -> vector<8x64xf32>
    %c0_57 = arith.constant 0 : index
    %c0_58 = arith.constant 0 : index
    %100 = vector.load %arg16[%c0_57, %c0_58] : memref<1x64xf32, #tpu.memory_space<vmem>>, vector<1x64xf32>
    %101 = vector.broadcast %100 : vector<1x64xf32> to vector<8x64xf32>
    %102 = arith.addf %99, %101 : vector<8x64xf32>
    %cst_59 = arith.constant 0.000000e+00 : f32
    %103 = vector.broadcast %cst_59 : f32 to vector<8x64xf32>
    %104 = arith.maximumf %102, %103 : vector<8x64xf32>
    %105 = arith.truncf %104 : vector<8x64xf32> to vector<8x64xbf16>
    %c0_60 = arith.constant 0 : index
    %c0_61 = arith.constant 0 : index
    %106 = vector.load %arg17[%c0_60, %c0_61] : memref<64x32xbf16, #tpu.memory_space<vmem>>, vector<64x32xbf16>
    %cst_62 = arith.constant dense<0.000000e+00> : vector<8x32xf32>
    %107 = tpu.matmul %105, %106, %cst_62 {dimension_numbers = #tpu.dot_dimension_numbers<[1], [0], [0], [1], [0, 0, 1, 1], [], []>} : vector<8x64xbf16>, vector<64x32xbf16>, vector<8x32xf32> -> vector<8x32xf32>
    %c0_63 = arith.constant 0 : index
    %c0_64 = arith.constant 0 : index
    %108 = vector.load %arg18[%c0_63, %c0_64] : memref<1x32xf32, #tpu.memory_space<vmem>>, vector<1x32xf32>
    %109 = vector.broadcast %108 : vector<1x32xf32> to vector<8x32xf32>
    %110 = arith.addf %107, %109 : vector<8x32xf32>
    %111 = arith.addf %72, %110 : vector<8x32xf32>
    %c0_65 = arith.constant 0 : index
    %c0_66 = arith.constant 0 : index
    %c0_67 = arith.constant 0 : index
    %112 = vector.load %arg19[%c0_65, %c0_66, %c0_67] : memref<1x8x32xf32, #tpu.memory_space<vmem>>, vector<1x8x32xf32>
    %113 = vector.shape_cast %112 : vector<1x8x32xf32> to vector<8x32xf32>
    %114 = vector.shape_cast %111 : vector<8x32xf32> to vector<1x8x32xf32>
    tpu.vector_store %arg19[%c0_65, %c0_66, %c0_67], %114 {strides = array<i32>} : memref<1x8x32xf32, #tpu.memory_space<vmem>>, vector<1x8x32xf32>,
    return
  }
  func.func @transform_0(%arg0: i32) -> (i32, i32, i32) {
    %c0_i32 = arith.constant 0 : i32
    %c0_i32_0 = arith.constant 0 : i32
    %c0_i32_1 = arith.constant 0 : i32
    return %arg0, %c0_i32, %c0_i32_0 : i32, i32, i32
  }
  func.func @transform_1(%arg0: i32) -> (i32, i32, i32) {
    %c0_i32 = arith.constant 0 : i32
    %c0_i32_0 = arith.constant 0 : i32
    %c0_i32_1 = arith.constant 0 : i32
    return %arg0, %c0_i32, %c0_i32_0 : i32, i32, i32
  }
  func.func @transform_2(%arg0: i32) -> (i32, i32) {
    %c0_i32 = arith.constant 0 : i32
    %c0_i32_0 = arith.constant 0 : i32
    %c0_i32_1 = arith.constant 0 : i32
    return %c0_i32, %c0_i32_0 : i32, i32
  }
  func.func @transform_3(%arg0: i32) -> (i32, i32) {
    %c0_i32 = arith.constant 0 : i32
    %c0_i32_0 = arith.constant 0 : i32
    %c0_i32_1 = arith.constant 0 : i32
    return %c0_i32, %c0_i32_0 : i32, i32
  }
  func.func @transform_4(%arg0: i32) -> (i32, i32, i32) {
    %c0_i32 = arith.constant 0 : i32
    %c0_i32_0 = arith.constant 0 : i32
    %c0_i32_1 = arith.constant 0 : i32
    %c0_i32_2 = arith.constant 0 : i32
    return %c0_i32, %c0_i32_0, %c0_i32_1 : i32, i32, i32
  }
  func.func @transform_5(%arg0: i32) -> (i32, i32, i32) {
    %c0_i32 = arith.constant 0 : i32
    %c0_i32_0 = arith.constant 0 : i32
    %c0_i32_1 = arith.constant 0 : i32
    %c0_i32_2 = arith.constant 0 : i32
    return %c0_i32, %c0_i32_0, %c0_i32_1 : i32, i32, i32
  }
  func.func @transform_6(%arg0: i32) -> (i32, i32, i32) {
    %c0_i32 = arith.constant 0 : i32
    %c0_i32_0 = arith.constant 0 : i32
    %c0_i32_1 = arith.constant 0 : i32
    %c0_i32_2 = arith.constant 0 : i32
    return %c0_i32, %c0_i32_0, %c0_i32_1 : i32, i32, i32
  }
  func.func @transform_7(%arg0: i32) -> (i32, i32, i32) {
    %c0_i32 = arith.constant 0 : i32
    %c0_i32_0 = arith.constant 0 : i32
    %c0_i32_1 = arith.constant 0 : i32
    %c0_i32_2 = arith.constant 0 : i32
    return %c0_i32, %c0_i32_0, %c0_i32_1 : i32, i32, i32
  }
  func.func @transform_8(%arg0: i32) -> (i32, i32, i32) {
    %c0_i32 = arith.constant 0 : i32
    %c0_i32_0 = arith.constant 0 : i32
    %c0_i32_1 = arith.constant 0 : i32
    %c0_i32_2 = arith.constant 0 : i32
    return %c0_i32, %c0_i32_0, %c0_i32_1 : i32, i32, i32
  }
  func.func @transform_9(%arg0: i32) -> (i32, i32, i32) {
    %c0_i32 = arith.constant 0 : i32
    %c0_i32_0 = arith.constant 0 : i32
    %c0_i32_1 = arith.constant 0 : i32
    %c0_i32_2 = arith.constant 0 : i32
    return %c0_i32, %c0_i32_0, %c0_i32_1 : i32, i32, i32
  }
  func.func @transform_10(%arg0: i32) -> (i32, i32, i32) {
    %c0_i32 = arith.constant 0 : i32
    %c0_i32_0 = arith.constant 0 : i32
    %c0_i32_1 = arith.constant 0 : i32
    %c0_i32_2 = arith.constant 0 : i32
    return %c0_i32, %c0_i32_0, %c0_i32_1 : i32, i32, i32
  }
  func.func @transform_11(%arg0: i32) -> (i32, i32) {
    %c0_i32 = arith.constant 0 : i32
    %c0_i32_0 = arith.constant 0 : i32
    %c0_i32_1 = arith.constant 0 : i32
    return %c0_i32, %c0_i32_0 : i32, i32
  }
  func.func @transform_12(%arg0: i32) -> (i32, i32) {
    %c0_i32 = arith.constant 0 : i32
    %c0_i32_0 = arith.constant 0 : i32
    %c0_i32_1 = arith.constant 0 : i32
    return %c0_i32, %c0_i32_0 : i32, i32
  }
  func.func @transform_13(%arg0: i32) -> (i32, i32) {
    %c0_i32 = arith.constant 0 : i32
    %c0_i32_0 = arith.constant 0 : i32
    %c0_i32_1 = arith.constant 0 : i32
    return %c0_i32, %c0_i32_0 : i32, i32
  }
  func.func @transform_14(%arg0: i32) -> (i32, i32) {
    %c0_i32 = arith.constant 0 : i32
    %c0_i32_0 = arith.constant 0 : i32
    %c0_i32_1 = arith.constant 0 : i32
    return %c0_i32, %c0_i32_0 : i32, i32
  }
  func.func @transform_15(%arg0: i32) -> (i32, i32) {
    %c0_i32 = arith.constant 0 : i32
    %c0_i32_0 = arith.constant 0 : i32
    %c0_i32_1 = arith.constant 0 : i32
    return %c0_i32, %c0_i32_0 : i32, i32
  }
  func.func @transform_16(%arg0: i32) -> (i32, i32) {
    %c0_i32 = arith.constant 0 : i32
    %c0_i32_0 = arith.constant 0 : i32
    %c0_i32_1 = arith.constant 0 : i32
    return %c0_i32, %c0_i32_0 : i32, i32
  }
  func.func @transform_17(%arg0: i32) -> (i32, i32) {
    %c0_i32 = arith.constant 0 : i32
    %c0_i32_0 = arith.constant 0 : i32
    %c0_i32_1 = arith.constant 0 : i32
    return %c0_i32, %c0_i32_0 : i32, i32
  }
  func.func @transform_18(%arg0: i32) -> (i32, i32, i32) {
    %c0_i32 = arith.constant 0 : i32
    %c0_i32_0 = arith.constant 0 : i32
    %c0_i32_1 = arith.constant 0 : i32
    return %arg0, %c0_i32, %c0_i32_0 : i32, i32, i32
  }
}

</mosaic_0001>

<bundles_post_ra>
// kernel: tpu_custom_call.1
= control target key start
LH: loop header
LB: loop body
LE: loop exit
PB: predicated region body
PF: predicated region fallthrough
CT: control target
= control target key end

     0   :  { %s3326_s0 = inlined_call_operand.vmem [shape: f32[2,8,32], index: 0, kind: input, shape index: {}]   ;;  %s3327_s1 = inlined_call_operand.vmem [shape: f32[2,1,8], index: 1, kind: input, shape index: {}]   ;;  %s3328_s2 = inlined_call_operand.vmem [shape: f32[1,32], index: 2, kind: input, shape index: {}]   ;;  %s3329_s3 = inlined_call_operand.vmem [shape: f32[1,32], index: 3, kind: input, shape index: {}]   ;;  %s3330_s4 = inlined_call_operand.vmem [shape: bf16[4,32,8], index: 4, kind: input, shape index: {}]   ;;  %s3331_s5 = inlined_call_operand.vmem [shape: f32[4,1,8], index: 5, kind: input, shape index: {}]   ;;  %s3332_s6 = inlined_call_operand.vmem [shape: bf16[4,32,8], index: 6, kind: input, shape index: {}]   ;;  %s3333_s7 = inlined_call_operand.vmem [shape: f32[4,1,8], index: 7, kind: input, shape index: {}]   ;;  %s3334_s8 = inlined_call_operand.vmem [shape: bf16[4,32,8], index: 8, kind: input, shape index: {}]   ;;  %s3335_s9 = inlined_call_operand.vmem [shape: f32[4,1,8], index: 9, kind: input, shape index: {}]   ;;  %s3336_s10 = inlined_call_operand.vmem [shape: bf16[4,8,32], index: 10, kind: input, shape index: {}]   ;;  %s3337_s11 = inlined_call_operand.vmem [shape: f32[1,32], index: 11, kind: input, shape index: {}]   ;;  %s3338_s12 = inlined_call_operand.vmem [shape: f32[1,32], index: 12, kind: input, shape index: {}]   ;;  %s3339_s13 = inlined_call_operand.vmem [shape: f32[1,32], index: 13, kind: input, shape index: {}]   ;;  %s3340_s14 = inlined_call_operand.vmem [shape: bf16[32,64], index: 14, kind: input, shape index: {}]   ;;  %s3341_s15 = inlined_call_operand.vmem [shape: f32[1,64], index: 15, kind: input, shape index: {}]   ;;  %s3342_s16 = inlined_call_operand.vmem [shape: bf16[64,32], index: 16, kind: input, shape index: {}]   ;;  %s3343_s17 = inlined_call_operand.vmem [shape: f32[1,32], index: 17, kind: input, shape index: {}]   ;;  %s3344_s18 = inlined_call_operand.hbm [shape: f32[2,8,32], index: 18, kind: output, shape index: {}]  }
   0x1   :  { %3349 = sst [smem:[#allocation9_spill]] %s3326_s0 }
   0x2   :  { %3350 = sst [smem:[#allocation10_spill]] %s3327_s1 }
   0x3   :  { %3351 = sst [smem:[#allocation11_spill]] %s3328_s2 }
   0x4   :  { %3352 = sst [smem:[#allocation12_spill]] %s3329_s3 }
   0x5   :  { %23 = vsyncpa [#allocation3], 0 }
   0x6   :  { %25 = vsyncpa [#allocation3 + $0x1], 0  ;;  %s2887_s27 = smov 0   ;;  %s2889_s28 = smov 0  }
   0x7   :  { %s2891_s29 = smov 0   ;;  %s2893_s30 = smov 0  }
   0x8 LB: > { %3353 = sst [smem:[#allocation5_spill]] %s2783_s29  ;;  %s2908_s0 = sadd.s32 4294967295, %s2787_s30   ;;  %s2787_s30 = sphi %s2893_s30, %s3364_s30   ;;  %s2783_s29 = sphi %s2891_s29, %s3369_s29   ;;  %s2779_s28 = sphi %s2889_s28, %s3368_s28   ;;  %s2775_s27 = sphi %s2887_s27, %s3367_s27  }
   0x9   : > { %s2292_s19 = sadd.s32 4294967294, %s2787_s30   ;;  %s2912_s1 = sadd.s32 1, %s2787_s30  }
   0xa   : > { %3354 = sst [smem:[#allocation6_spill]] %s2912_s1  ;;  %s426_s20 = sadd.s32 1, %s2783_s29 }
   0xb   : > { %s423_s21 = ssub.s32 %s2787_s30, %s2912_s1  ;;  %p436_p0 = scmp.ne.s32.totalorder %s2783_s29, %s2779_s28 }
   0xc   : > { %p424_p1 = scmp.eq.s32.totalorder %s423_s21, 0  ;;  %p437_p2 = scmp.eq.s32.totalorder %s2908_s0, 1 }
   0xd   : > { %p442_p3 = scmp.ne.s32.totalorder %s2779_s28, %s2775_s27  ;;  %p443_p4 = scmp.eq.s32.totalorder %s2292_s19, 1 }
   0xe   : > { %s2923_s22 = scalar_select %p424_p1, %s2783_s29, %s426_s20  }
   0xf   : > { %p2925_p5 = por %p437_p2, %p436_p0  ;;  %p2929_p6 = por %p443_p4, %p442_p3 }
  0x10   : > { %3355 = sst [smem:[#allocation7_spill]] %s2923_s22  ;;  %p2295_p7 = scmp.ge.s32.totalorder %s2787_s30, 1 }
  0x11   : > { %s3357_s23 = scalar_select %p2929_p6, 1, 0 }
  0x12   : > { %p522_p8 = scmp.lt.s32.totalorder %s2787_s30, 3 }
  0x13   : > { %3358 = sst [smem:[#allocation8_spill]] %s3357_s23 }
  0x14   : > { %p523_p9 = pnand %p2295_p7, %p522_p8 }
  0x15   : > { %p578_p10 = scmp.lt.s32.totalorder (!%p523_p9), %s2908_s0, 1  ;;  %vm590_vm0 = vcmask (!%p523_p9), 261120   ;;  %s3359_s20 = sld [smem:[#allocation9_spill]] (!%p523_p9)  ;;  %v2675_v7 = vld [vmem:[%s3330_s4] sm:$0xff] (!%p523_p9)   ;;  %v2676_v8 = vld [vmem:[%s3330_s4 + $0x10] sm:$0xff] (!%p523_p9)   ;;  %v2789_v9 = vmov (!%p523_p9), 0.0  }
  0x16   : > { %526 = sbr.rel (%p523_p9) target bundleno = 2327 (0x917), region = 92  ;;  %2446 = vmatprep.subr.bf16.mxu0 (!%p523_p9), %v2789_v9  ;;  %2454 = vmatprep.subr.bf16.mxu1 (!%p523_p9), %v2789_v9  ;;  %v2677_v10 = vld [vmem:[%s3330_s4 + $0x8] sm:$0xff] (!%p523_p9)   ;;  %v2678_v11 = vld [vmem:[%s3330_s4 + $0x18] sm:$0xff] (!%p523_p9)   ;;  %vm2790_vm1 = vmmov (!%p523_p9), 0   ;;  %s3361_s3 = sld [smem:[#allocation12_spill]] (!%p523_p9)  ;;  %v2679_v21 = vld [vmem:[%s3330_s4 + $0x20] sm:$0xff] (!%p523_p9)  }
  0x17   : > { %2447 = vmatpush3.bf16.msra.mxu0 (!%p523_p9), %v2675_v7  ;;  %2455 = vmatpush3.bf16.msra.mxu1 (!%p523_p9), %v2676_v8  ;;  %v2680_v22 = vld [vmem:[%s3330_s4 + $0x30] sm:$0xff] (!%p523_p9)   ;;  %v2681_v24 = vld [vmem:[%s3330_s4 + $0x28] sm:$0xff] (!%p523_p9)   ;;  %v2682_v25 = vld [vmem:[%s3330_s4 + $0x38] sm:$0xff] (!%p523_p9)   ;;  %vm1387_vm2 = vcmask (!%p523_p9), 64512   ;;  %vm1637_vm3 = vcmask (!%p523_p9), 1043456   ;;  %s3362_s1 = sld [smem:[#allocation10_spill]] (!%p523_p9) }
  0x18   : > { %2448 = vmatprep.subr.bf16.mxu0 (!%p523_p9), %v2789_v9  ;;  %2456 = vmatprep.subr.bf16.mxu1 (!%p523_p9), %v2789_v9  ;;  %v2683_v26 = vld [vmem:[%s3332_s6] sm:$0xff] (!%p523_p9)   ;;  %v2684_v27 = vld [vmem:[%s3332_s6 + $0x10] sm:$0xff] (!%p523_p9)   ;;  %v2685_v28 = vld [vmem:[%s3332_s6 + $0x8] sm:$0xff] (!%p523_p9)   ;;  %vm2164_vm4 = vcmask (!%p523_p9), 523264   ;;  %s575_s29 = sand.u32 (!%p523_p9), 1, %s2779_s28  }
  0x19   : > { %2450 = vmatprep.mubr.msk.bf16.mxu0 (!%p523_p9), %vm2790_vm1, %v2789_v9  ;;  %2458 = vmatprep.mubr.msk.bf16.mxu1 (!%p523_p9), %vm2790_vm1, %v2789_v9  ;;  %v2686_v29 = vld [vmem:[%s3332_s6 + $0x18] sm:$0xff] (!%p523_p9)   ;;  %v2687_v30 = vld [vmem:[%s3332_s6 + $0x20] sm:$0xff] (!%p523_p9)   ;;  %v2688_v31 = vld [vmem:[%s3332_s6 + $0x30] sm:$0xff] (!%p523_p9)   ;;  %s2296_s22 = sshll.u32 (!%p523_p9), %s575_s29, 3 }
  0x1a   : > { %v2689_v32 = vld [vmem:[%s3332_s6 + $0x28] sm:$0xff] (!%p523_p9)   ;;  %v2690_v33 = vld [vmem:[%s3332_s6 + $0x38] sm:$0xff] (!%p523_p9)   ;;  %v2691_v34 = vld [vmem:[%s3334_s8] sm:$0xff] (!%p523_p9)   ;;  %s577_s19 = scalar_lea.vmem (!%p523_p9), [#allocation2], %s2296_s22 }
  0x1b   : > { %2449 = vmatpush3.bf16.msra.mxu0 (!%p523_p9), %v2677_v10  ;;  %2457 = vmatpush3.bf16.msra.mxu1 (!%p523_p9), %v2678_v11  ;;  %v2692_v35 = vld [vmem:[%s3334_s8 + $0x10] sm:$0xff] (!%p523_p9)   ;;  %v2693_v36 = vld [vmem:[%s3334_s8 + $0x8] sm:$0xff] (!%p523_p9)   ;;  %v2694_v37 = vld [vmem:[%s3334_s8 + $0x18] sm:$0xff] (!%p523_p9)  }
  0x1c   : > { %2462 = vmatprep.subr.bf16.mxu0 (!%p523_p9), %v2789_v9  ;;  %2470 = vmatprep.subr.bf16.mxu1 (!%p523_p9), %v2789_v9  ;;  %v2299_v18 = vld [vmem:[%s3361_s3] ss:$0 sm:$0xff] (!%p523_p9)  ;;  %v2696_v39 = vld [vmem:[%s3334_s8 + $0x30] sm:$0xff] (!%p523_p9)   ;;  %v2697_v40 = vld [vmem:[%s3334_s8 + $0x28] sm:$0xff] (!%p523_p9)  }
  0x1d   : > { %s2937_s24 = scalar_select %p578_p10, %s2908_s0, 1  ;;  %v2695_v38 = vld [vmem:[%s3334_s8 + $0x20] sm:$0xff]   ;;  %v2698_v41 = vld [vmem:[%s3334_s8 + $0x38] sm:$0xff]  }
  0x1e   : > { %v2316_v58 = vld [vmem:[%s3333_s7] ss:$0 sm:$0xff]  ;;  %v2317_v59 = vld [vmem:[%s3333_s7 + $0x1] ss:$0 sm:$0xff] }
  0x1f   : > { %s2297_s25 = sshll.u32 %s2937_s24, 3  ;;  %v2300_v10 = vld [vmem:[%s3331_s5] ss:$0 sm:$0xff]  ;;  %v2301_v11 = vld [vmem:[%s3331_s5 + $0x1] ss:$0 sm:$0xff]  ;;  %s584_s23 = scalar_lea.vmem %s3362_s1, %s2937_s24 }
  0x20   : > { %s581_s21 = scalar_lea.vmem %s3359_s20, %s2297_s25  ;;  %s3360_s25 = sld [smem:[#allocation11_spill]] }
  0x21   : > { %v2943_v0 = vld [vmem:[%s581_s21] sm:$0xff]  ;;  %s2224_s1 = sshll.u32 %s577_s19, 4  ;;  %s2791_s21 = smov [#allocation2]   ;;  %s3285_s1 = int_to_ptr.vmem [resolvable:$true] %s2224_s1 }
  0x22   : > { %v591_v1 = vsel %vm590_vm0, %v2943_v0, 0.0  ;;  %s2725_s22 = scalar_lea.vmem %s3285_s1, 128  ;;  %s2729_s26 = sshll.u32 %s2791_s21, 4  ;;  %s2730_s26 = int_to_ptr.vmem [resolvable:$false] %s2729_s26 }
  0x23   : > { %592 = vadd.xlane.f32.xlu0 %v591_v1  ;;  %p2726_p11 = scmp.ne.s32.totalorder %s3285_s1, %s2725_s22  ;;  %s2731_s3 = scalar_lea.vmem %s2730_s26, 256 }
  0x24   : > { %p2732_p0 = scmp.lt.s32.totalorder %s3285_s1, %s2730_s26  ;;  %p2733_p1 = scmp.lt.s32.totalorder %s2731_s3, %s2725_s22 }
  0x25   : > { %p2727_p12 = pnand %p2726_p11, %p2925_p5 }
  0x26   : > { %v2298_v16 = vld [vmem:[%s3360_s25] ss:$0 sm:$0xff]  ;;  %s2375_s25 = sshll.u32 %s2908_s0, 7  ;;  %s2211_s0 = scalar_lea.sflag [#allocation3], %s575_s29 }
  0x27   : > { %s3283_s20 = scalar_lea.hbm %s3344_s18, %s2375_s25  ;;  %p2728_p13 = pneg %p2727_p12 }
  0x28   : > { %p2734_p2 = por %p2733_p1, %p2732_p0 }
  0x2a   : > { %p2735_p3 = pnand %p2734_p2, %p2728_p13 }
  0xb0   : > { %v593_v2 = vpop.xlane.xlu0 %592 }
  0xb1   : > { %v595_v3 = vmul.f32 0.03125, %v593_v2 }
  0xb3   : > { %v596_v4 = vsub.f32 %v2943_v0, %v595_v3 }
  0xb5   : > { %v597_v5 = vmul.f32 %v596_v4, %v596_v4 }
  0xb7   : > { %v598_v6 = vsel %vm590_vm0, %v597_v5, 0.0 }
  0xb8   : > { %599 = vadd.xlane.f32.xlu0 %v598_v6 }
 0x145   : > { %v600_v12 = vpop.xlane.xlu0 %599 }
 0x146   : > { %v601_v13 = vmul.f32 0.03125, %v600_v12 }
 0x148   : > { %v602_v14 = vadd.f32 1e-05, %v601_v13 }
 0x14a   : > { %2705 = vrsqrt.f32 %v602_v14  ;;  %v2318_v14 = vld [vmem:[%s3333_s7 + $0x2] ss:$0 sm:$0xff] }
 0x154   : > { %v2706_v15 = vpop.eup %2705 }
 0x155   : > { %v604_v17 = vmul.f32 %v2706_v15, %v596_v4  ;;  %v2319_v15 = vld [vmem:[%s3333_s7 + $0x3] ss:$0 sm:$0xff] }
 0x157   : > { %v611_v19 = vmul.f32 %v2298_v16, %v604_v17 }
 0x159   : > { %v618_v20 = vadd.f32 %v2299_v18, %v611_v19 }
 0x15b   : > { %v2983_v23 = vpack.c.bf16 %v618_v20, %v618_v20 }
 0x15d   : > { %2451 = vmatmul.mubr.msk.bf16.vlgmr.msra.gmra.mrb[0].mxu0 %vm590_vm0, %v2983_v23  ;;  %2459 = vmatmul.mubr.msk.bf16.vlgmr.msra.gmra.mrb[0].mxu1 %vm590_vm0, %v2983_v23 }
 0x15e   : > { %2463 = vmatpush3.bf16.msra.mxu0 %v2679_v21  ;;  %2471 = vmatpush3.bf16.msra.mxu1 %v2680_v22 }
 0x15f   : > { %2464 = vmatprep.subr.bf16.mxu0 %v2789_v9  ;;  %2472 = vmatprep.subr.bf16.mxu1 %v2789_v9 }
 0x160   : > { %2466 = vmatprep.mubr.msk.bf16.mxu0 %vm2790_vm1, %v2789_v9  ;;  %2474 = vmatprep.mubr.msk.bf16.mxu1 %vm2790_vm1, %v2789_v9 }
 0x162   : > { %2465 = vmatpush3.bf16.msra.mxu0 %v2681_v24  ;;  %2473 = vmatpush3.bf16.msra.mxu1 %v2682_v25 }
 0x163   : > { %2478 = vmatprep.subr.bf16.mxu0 %v2789_v9  ;;  %2486 = vmatprep.subr.bf16.mxu1 %v2789_v9 }
 0x165   : > { %2467 = vmatmul.mubr.msk.bf16.vlgmr.msra.gmra.mrb[4].mxu0 %vm590_vm0, %v2983_v23  ;;  %2475 = vmatmul.mubr.msk.bf16.vlgmr.msra.gmra.mrb[4].mxu1 %vm590_vm0, %v2983_v23 }
 0x166   : > { %2479 = vmatpush3.bf16.msra.mxu0 %v2683_v26  ;;  %2487 = vmatpush3.bf16.msra.mxu1 %v2684_v27 }
 0x167   : > { %2480 = vmatprep.subr.bf16.mxu0 %v2789_v9  ;;  %2488 = vmatprep.subr.bf16.mxu1 %v2789_v9 }
 0x168   : > { %2482 = vmatprep.mubr.msk.bf16.mxu0 %vm2790_vm1, %v2789_v9  ;;  %2490 = vmatprep.mubr.msk.bf16.mxu1 %vm2790_vm1, %v2789_v9 }
 0x16a   : > { %2481 = vmatpush3.bf16.msra.mxu0 %v2685_v28  ;;  %2489 = vmatpush3.bf16.msra.mxu1 %v2686_v29 }
 0x16b   : > { %2494 = vmatprep.subr.bf16.mxu0 %v2789_v9  ;;  %2502 = vmatprep.subr.bf16.mxu1 %v2789_v9 }
 0x16d   : > { %2483 = vmatmul.mubr.msk.bf16.vlgmr.msra.gmra.mrb[8].mxu0 %vm590_vm0, %v2983_v23  ;;  %2491 = vmatmul.mubr.msk.bf16.vlgmr.msra.gmra.mrb[8].mxu1 %vm590_vm0, %v2983_v23 }
 0x16e   : > { %2495 = vmatpush3.bf16.msra.mxu0 %v2687_v30  ;;  %2503 = vmatpush3.bf16.msra.mxu1 %v2688_v31 }
 0x16f   : > { %2496 = vmatprep.subr.bf16.mxu0 %v2789_v9  ;;  %2504 = vmatprep.subr.bf16.mxu1 %v2789_v9 }
 0x170   : > { %2498 = vmatprep.mubr.msk.bf16.mxu0 %vm2790_vm1, %v2789_v9  ;;  %2506 = vmatprep.mubr.msk.bf16.mxu1 %vm2790_vm1, %v2789_v9 }
 0x172   : > { %2497 = vmatpush3.bf16.msra.mxu0 %v2689_v32  ;;  %2505 = vmatpush3.bf16.msra.mxu1 %v2690_v33  ;;  %v2302_v32 = vld [vmem:[%s3331_s5 + $0x2] ss:$0 sm:$0xff]  ;;  %v2303_v33 = vld [vmem:[%s3331_s5 + $0x3] ss:$0 sm:$0xff] }
 0x173   : > { %2510 = vmatprep.subr.bf16.mxu0 %v2789_v9  ;;  %2518 = vmatprep.subr.bf16.mxu1 %v2789_v9 }
 0x175   : > { %2499 = vmatmul.mubr.msk.bf16.vlgmr.msra.gmra.mrb[12].mxu0 %vm590_vm0, %v2983_v23  ;;  %2507 = vmatmul.mubr.msk.bf16.vlgmr.msra.gmra.mrb[12].mxu1 %vm590_vm0, %v2983_v23 }
 0x176   : > { %2511 = vmatpush3.bf16.msra.mxu0 %v2691_v34  ;;  %2519 = vmatpush3.bf16.msra.mxu1 %v2692_v35 }
 0x177   : > { %2512 = vmatprep.subr.bf16.mxu0 %v2789_v9  ;;  %2520 = vmatprep.subr.bf16.mxu1 %v2789_v9 }
 0x178   : > { %2514 = vmatprep.mubr.msk.bf16.mxu0 %vm2790_vm1, %v2789_v9  ;;  %2522 = vmatprep.mubr.msk.bf16.mxu1 %vm2790_vm1, %v2789_v9 }
 0x17a   : > { %2513 = vmatpush3.bf16.msra.mxu0 %v2693_v36  ;;  %2521 = vmatpush3.bf16.msra.mxu1 %v2694_v37  ;;  %v2332_v36 = vld [vmem:[%s3335_s9] ss:$0 sm:$0xff]  ;;  %v2333_v37 = vld [vmem:[%s3335_s9 + $0x1] ss:$0 sm:$0xff] }
 0x17b   : > { %2526 = vmatprep.subr.bf16.mxu0 %v2789_v9  ;;  %2534 = vmatprep.subr.bf16.mxu1 %v2789_v9 }
 0x17d   : > { %2515 = vmatmul.mubr.msk.bf16.vlgmr.msra.gmra.mrb[16].mxu0 %vm590_vm0, %v2983_v23  ;;  %2523 = vmatmul.mubr.msk.bf16.vlgmr.msra.gmra.mrb[16].mxu1 %vm590_vm0, %v2983_v23 }
 0x17e   : > { %2527 = vmatpush3.bf16.msra.mxu0 %v2695_v38  ;;  %2535 = vmatpush3.bf16.msra.mxu1 %v2696_v39 }
 0x17f   : > { %2528 = vmatprep.subr.bf16.mxu0 %v2789_v9  ;;  %2536 = vmatprep.subr.bf16.mxu1 %v2789_v9 }
 0x180   : > { %2530 = vmatprep.mubr.msk.bf16.mxu0 %vm2790_vm1, %v2789_v9  ;;  %2538 = vmatprep.mubr.msk.bf16.mxu1 %vm2790_vm1, %v2789_v9 }
 0x182   : > { %2529 = vmatpush3.bf16.msra.mxu0 %v2697_v40  ;;  %2537 = vmatpush3.bf16.msra.mxu1 %v2698_v41 }
 0x183   : > { %2542 = vmatprep.subr.bf16.mxu0 %v2789_v9  ;;  %2548 = vmatprep.subr.bf16.mxu1 %v2789_v9 }
 0x185   : > { %2531 = vmatmul.mubr.msk.bf16.vlgmr.msra.gmra.mrb[20].mxu0 %vm590_vm0, %v2983_v23  ;;  %2539 = vmatmul.mubr.msk.bf16.vlgmr.msra.gmra.mrb[20].mxu1 %vm590_vm0, %v2983_v23 }
 0x186   : > { %2544 = vmatprep.mubr.msk.bf16.mxu0 %vm2790_vm1, %v2789_v9  ;;  %2550 = vmatprep.mubr.msk.bf16.mxu1 %vm2790_vm1, %v2789_v9 }
 0x230   : > { %v713_v42 = vpop.f32.mrb[0].mxu0  ;;  %v765_v43 = vpop.f32.mrb[0].mxu1 }
 0x231   : > { %v2452_v44 = vpop.f32.mrb[1].mxu0  ;;  %v2460_v45 = vpop.f32.mrb[1].mxu1  ;;  %v714_v16 = vadd.f32 %v2300_v10, %v713_v42  ;;  %v766_v17 = vadd.f32 %v2301_v11, %v765_v43 }
 0x232   : > { %v716_v46 = vpop.f32.mrb[2].mxu0  ;;  %v768_v47 = vpop.f32.mrb[2].mxu1 }
 0x233   : > { %v2453_v48 = vpop.f32.mrb[3].mxu0  ;;  %v2461_v49 = vpop.f32.mrb[3].mxu1  ;;  %v1379_v26 = vpack.c.bf16 %v714_v16, %v714_v16  ;;  %v1380_v27 = vpack.c.bf16 %v766_v17, %v766_v17 }
 0x238   : > { %v817_v50 = vpop.f32.mrb[4].mxu0  ;;  %v869_v51 = vpop.f32.mrb[4].mxu1 }
 0x239   : > { %v2468_v52 = vpop.f32.mrb[5].mxu0  ;;  %v2476_v53 = vpop.f32.mrb[5].mxu1  ;;  %v818_v38 = vadd.f32 %v2302_v32, %v817_v50  ;;  %v870_v39 = vadd.f32 %v2303_v33, %v869_v51 }
 0x23a   : > { %v820_v54 = vpop.f32.mrb[6].mxu0  ;;  %v872_v55 = vpop.f32.mrb[6].mxu1 }
 0x23b   : > { %v2469_v56 = vpop.f32.mrb[7].mxu0  ;;  %v2477_v57 = vpop.f32.mrb[7].mxu1  ;;  %v1381_v48 = vpack.c.bf16 %v818_v38, %v818_v38  ;;  %v1382_v49 = vpack.c.bf16 %v870_v39, %v870_v39 }
 0x240   : > { %v965_v60 = vpop.f32.mrb[8].mxu0  ;;  %v1017_v61 = vpop.f32.mrb[8].mxu1 }
 0x241   : > { %v966_v62 = vadd.f32 %v2316_v58, %v965_v60  ;;  %v1018_v63 = vadd.f32 %v2317_v59, %v1017_v61  ;;  %v2484_v1 = vpop.f32.mrb[9].mxu0  ;;  %v2492_v2 = vpop.f32.mrb[9].mxu1 }
 0x242   : > { %v968_v3 = vpop.f32.mrb[10].mxu0  ;;  %v1020_v4 = vpop.f32.mrb[10].mxu1  ;;  %v2352_v1 = vld [vmem:[%s584_s23] ss:$0 sm:$0xff] }
 0x243   : > { %v1383_v5 = vpack.c.bf16 %v966_v62, %v966_v62  ;;  %v1384_v6 = vpack.c.bf16 %v1018_v63, %v1018_v63  ;;  %v2485_v7 = vpop.f32.mrb[11].mxu0  ;;  %v2493_v8 = vpop.f32.mrb[11].mxu1 }
 0x245   : > { %v1392_v12 = vsel %vm1387_vm2, %v1383_v5, 0  ;;  %v1438_v13 = vsel %vm1387_vm2, %v1384_v6, 0 }
 0x246   : > { %2543 = vmatpush3.bf16.xpose.msra.mxu0 %v1392_v12  ;;  %2549 = vmatpush3.bf16.xpose.msra.mxu1 %v1438_v13 }
 0x247   : > { %2554 = vmatprep.subr.bf16.mxu0 %v2789_v9  ;;  %2560 = vmatprep.subr.bf16.mxu1 %v2789_v9 }
 0x248   : > { %v1069_v18 = vpop.f32.mrb[12].mxu0  ;;  %v1121_v19 = vpop.f32.mrb[12].mxu1 }
 0x249   : > { %v1070_v20 = vadd.f32 %v2318_v14, %v1069_v18  ;;  %v1122_v21 = vadd.f32 %v2319_v15, %v1121_v19  ;;  %v2500_v22 = vpop.f32.mrb[13].mxu0  ;;  %v2508_v23 = vpop.f32.mrb[13].mxu1 }
 0x24a   : > { %v1072_v24 = vpop.f32.mrb[14].mxu0  ;;  %v1124_v25 = vpop.f32.mrb[14].mxu1 }
 0x24b   : > { %v1385_v28 = vpack.c.bf16 %v1070_v20, %v1070_v20  ;;  %v1386_v29 = vpack.c.bf16 %v1122_v21, %v1122_v21  ;;  %v2501_v30 = vpop.f32.mrb[15].mxu0  ;;  %v2509_v31 = vpop.f32.mrb[15].mxu1 }
 0x24d   : > { %v1484_v34 = vsel %vm1387_vm2, %v1385_v28, 0  ;;  %v1530_v35 = vsel %vm1387_vm2, %v1386_v29, 0  ;;  %2545 = vmatmul.mubr.msk.bf16.vlgmr.msra.gmra.mrb[24].mxu0 %vm1387_vm2, %v1379_v26  ;;  %2551 = vmatmul.mubr.msk.bf16.vlgmr.msra.gmra.mrb[24].mxu1 %vm1387_vm2, %v1380_v27 }
 0x24e   : > { %2555 = vmatpush3.bf16.xpose.msra.mxu0 %v1484_v34  ;;  %2561 = vmatpush3.bf16.xpose.msra.mxu1 %v1530_v35 }
 0x24f   : > { %2556 = vmatprep.mubr.msk.bf16.mxu0 %vm2790_vm1, %v2789_v9  ;;  %2562 = vmatprep.mubr.msk.bf16.mxu1 %vm2790_vm1, %v2789_v9 }
 0x250   : > { %v1217_v40 = vpop.f32.mrb[16].mxu0  ;;  %v1269_v41 = vpop.f32.mrb[16].mxu1  ;;  %2566 = vmatprep.subr.bf16.mxu0 %v2789_v9  ;;  %2572 = vmatprep.subr.bf16.mxu1 %v2789_v9 }
 0x251   : > { %v1218_v42 = vadd.f32 %v2332_v36, %v1217_v40  ;;  %v1270_v43 = vadd.f32 %v2333_v37, %v1269_v41  ;;  %v2516_v44 = vpop.f32.mrb[17].mxu0  ;;  %v2524_v45 = vpop.f32.mrb[17].mxu1 }
 0x252   : > { %v1220_v46 = vpop.f32.mrb[18].mxu0  ;;  %v1272_v47 = vpop.f32.mrb[18].mxu1 }
 0x253   : > { %v1630_v50 = vpack.c.bf16 %v1218_v42, %v1218_v42  ;;  %v1631_v51 = vpack.c.bf16 %v1270_v43, %v1270_v43  ;;  %v2517_v52 = vpop.f32.mrb[19].mxu0  ;;  %v2525_v53 = vpop.f32.mrb[19].mxu1 }
 0x254   : > { %v2335_v52 = vld [vmem:[%s3335_s9 + $0x3] ss:$0 sm:$0xff] }
 0x255   : > { %v1639_v54 = vsel %vm1637_vm3, %v1630_v50, 0  ;;  %v1685_v55 = vsel %vm1637_vm3, %v1631_v51, 0  ;;  %2557 = vmatmul.mubr.msk.bf16.vlgmr.msra.gmra.mrb[28].mxu0 %vm1387_vm2, %v1381_v48  ;;  %2563 = vmatmul.mubr.msk.bf16.vlgmr.msra.gmra.mrb[28].mxu1 %vm1387_vm2, %v1382_v49  ;;  %v2334_v49 = vld [vmem:[%s3335_s9 + $0x2] ss:$0 sm:$0xff] }
 0x256   : > { %2567 = vmatpush3.bf16.msra.mxu0 %v1639_v54  ;;  %2573 = vmatpush3.bf16.msra.mxu1 %v1685_v55 }
 0x257   : > { %2568 = vmatprep.mubr.msk.bf16.mxu0 %vm2790_vm1, %v2789_v9  ;;  %2578 = vmatprep.subr.bf16.mxu0 %v2789_v9 }
 0x258   : > { %v3158_v56 = vpop.f32.mrb[20].mxu0  ;;  %v3160_v57 = vpop.f32.mrb[20].mxu1  ;;  %2574 = vmatprep.mubr.msk.bf16.mxu1 %vm2790_vm1, %v2789_v9  ;;  %2584 = vmatprep.subr.bf16.mxu1 %v2789_v9 }
 0x259   : > { %v2532_v58 = vpop.f32.mrb[21].mxu0  ;;  %v2540_v59 = vpop.f32.mrb[21].mxu1  ;;  %v1322_v50 = vadd.f32 %v2334_v49, %v3158_v56 }
 0x25a   : > { %v1324_v60 = vpop.f32.mrb[22].mxu0  ;;  %v1376_v61 = vpop.f32.mrb[22].mxu1  ;;  %v1374_v58 = vadd.f32 %v2335_v52, %v3160_v57 }
 0x25b   : > { %v2533_v62 = vpop.f32.mrb[23].mxu0  ;;  %v2541_v63 = vpop.f32.mrb[23].mxu1  ;;  %v1632_v55 = vpack.c.bf16 %v1322_v50, %v1322_v50 }
 0x25c   : > { %v1633_v63 = vpack.c.bf16 %v1374_v58, %v1374_v58  ;;  %v2361_v58 = vld [vmem:[%s3337_s11] ss:$0 sm:$0xff] }
 0x25d   : > { %v1731_v62 = vsel %vm1637_vm3, %v1632_v55, 0 }
 0x25e   : > { %v1777_v57 = vsel %vm1637_vm3, %v1633_v63, 0 }
 0x320   : > { %v1428_v2 = vpop.f32.mrb[24].mxu0  ;;  %v1474_v3 = vpop.f32.mrb[24].mxu1 }
 0x321   : > { %v1578_v4 = vmin.f32 %v1428_v2, %v2352_v1  ;;  %v2546_v5 = vpop.f32.mrb[25].mxu0  ;;  %v2552_v6 = vpop.f32.mrb[25].mxu1  ;;  %v1579_v10 = vmin.f32 %v1474_v3, %v2352_v1 }
 0x322   : > { %v1431_v7 = vpop.f32.mrb[26].mxu0  ;;  %v1477_v8 = vpop.f32.mrb[26].mxu1 }
 0x323   : > { %v2547_v11 = vpop.f32.mrb[27].mxu0  ;;  %v2553_v12 = vpop.f32.mrb[27].mxu1  ;;  %v1582_v13 = vsel %vm1387_vm2, %v1578_v4, -inf  ;;  %v1585_v14 = vsel %vm1387_vm2, %v1579_v10, -inf }
 0x324   : > { %1583 = vmax.xlane.f32.xlu1 %v1582_v13  ;;  %v1824_v11 = vld [vmem:[%s3336_s10 + $0x4] sm:$0xf]  ;;  %v1825_v13 = vld [vmem:[%s3336_s10 + $0x8] sm:$0xf] }
 0x325   : > { %v1877_v12 = vsel %vm1637_vm3, %v1824_v11, 0 }
 0x328   : > { %v1566_v15 = vpop.f32.mrb[28].mxu1  ;;  %1586 = vmax.xlane.f32.xlu1 %v1585_v14  ;;  %v1520_v16 = vpop.f32.mrb[28].mxu0 }
 0x329   : > { %v1581_v17 = vmin.f32 %v1566_v15, %v2352_v1  ;;  %v1580_v18 = vmin.f32 %v1520_v16, %v2352_v1  ;;  %v2558_v19 = vpop.f32.mrb[29].mxu0  ;;  %v2564_v20 = vpop.f32.mrb[29].mxu1 }
 0x32a   : > { %v1523_v21 = vpop.f32.mrb[30].mxu0  ;;  %v1569_v22 = vpop.f32.mrb[30].mxu1  ;;  %v1826_v19 = vld [vmem:[%s3336_s10 + $0xc] sm:$0xf] }
 0x32b   : > { %v2559_v23 = vpop.f32.mrb[31].mxu0  ;;  %v2565_v24 = vpop.f32.mrb[31].mxu1  ;;  %v1591_v25 = vsel %vm1387_vm2, %v1581_v17, -inf  ;;  %v1588_v26 = vsel %vm1387_vm2, %v1580_v18, -inf }
 0x32c   : > { %1592 = vmax.xlane.f32.xlu1 %v1591_v25  ;;  %1589 = vmax.xlane.f32.xlu0 %v1588_v26  ;;  %v1969_v24 = vsel %vm1637_vm3, %v1826_v19, 0 }
 0x3b1   : > { %v1584_v27 = vpop.xlane.xlu1 %1583 }
 0x3b2   : > { %v1594_v28 = vsub.f32 %v1578_v4, %v1584_v27  ;;  %v1823_v4 = vld [vmem:[%s3336_s10] sm:$0xf] }
 0x3b3   : > { %v1831_v8 = vsel %vm1637_vm3, %v1823_v4, 0 }
 0x3b4   : > { %v1598_v29 = vmul.f32 1.442695, %v1594_v28 }
 0x3b5   : > { %v1587_v30 = vpop.xlane.xlu1 %1586 }
 0x3b6   : > { %2707 = vpow2.f32 %v1598_v29  ;;  %v1595_v31 = vsub.f32 %v1579_v10, %v1587_v30 }
 0x3b8   : > { %v1600_v32 = vmul.f32 1.442695, %v1595_v31 }
 0x3b9   : > { %v1593_v33 = vpop.xlane.xlu1 %1592  ;;  %v1590_v34 = vpop.xlane.xlu0 %1589 }
 0x3ba   : > { %2709 = vpow2.f32 %v1600_v32  ;;  %v1597_v35 = vsub.f32 %v1581_v17, %v1593_v33  ;;  %v1596_v36 = vsub.f32 %v1580_v18, %v1590_v34  ;;  %v1923_v17 = vsel %vm1637_vm3, %v1825_v13, 0 }
 0x3bc   : > { %v1604_v37 = vmul.f32 1.442695, %v1597_v35  ;;  %v1602_v38 = vmul.f32 1.442695, %v1596_v36 }
 0x3be   : > { %2711 = vpow2.f32 %v1604_v37 }
 0x3bf   : > { %2713 = vpow2.f32 %v1602_v38 }
 0x3c0   : > { %v2708_v39 = vpop.eup %2707 }
 0x3c1   : > { %v1606_v40 = vsel %vm1387_vm2, %v2708_v39, 0.0 }
 0x3c2   : > { %1607 = vadd.xlane.f32.xlu0 %v1606_v40 }
 0x3c4   : > { %v2710_v41 = vpop.eup %2709 }
 0x3c5   : > { %v1609_v42 = vsel %vm1387_vm2, %v2710_v41, 0.0 }
 0x3c6   : > { %1610 = vadd.xlane.f32.xlu1 %v1609_v42 }
 0x3c8   : > { %v2712_v43 = vpop.eup %2711 }
 0x3c9   : > { %v2714_v44 = vpop.eup %2713  ;;  %v1615_v45 = vsel %vm1387_vm2, %v2712_v43, 0.0 }
 0x3ca   : > { %1616 = vadd.xlane.f32.xlu1 %v1615_v45  ;;  %v1612_v46 = vsel %vm1387_vm2, %v2714_v44, 0.0 }
 0x3cb   : > { %1613 = vadd.xlane.f32.xlu0 %v1612_v46 }
 0x44f   : > { %v1608_v47 = vpop.xlane.xlu0 %1607 }
 0x450   : > { %2715 = vrcp.f32 %v1608_v47 }
 0x453   : > { %v1611_v48 = vpop.xlane.xlu1 %1610 }
 0x454   : > { %2717 = vrcp.f32 %v1611_v48 }
 0x457   : > { %v1617_v51 = vpop.xlane.xlu1 %1616 }
 0x458   : > { %2719 = vrcp.f32 %v1617_v51  ;;  %v1614_v53 = vpop.xlane.xlu0 %1613 }
 0x459   : > { %2721 = vrcp.f32 %v1614_v53 }
 0x45a   : > { %v2716_v54 = vpop.eup %2715 }
 0x45b   : > { %v1622_v59 = vmul.f32 %v2716_v54, %v2708_v39 }
 0x45d   : > { %v1626_v60 = vpack.c.bf16 %v1622_v59, %v1622_v59 }
 0x45e   : > { %v2718_v61 = vpop.eup %2717 }
 0x45f   : > { %v1623_v1 = vmul.f32 %v2718_v61, %v2710_v41  ;;  %2569 = vmatmul.mubr.msk.bf16.vlgmr.msra.gmra.mrb[32].mxu0 %vm1387_vm2, %v1626_v60 }
 0x460   : > { %2579 = vmatpush3.bf16.msra.mxu0 %v1731_v62  ;;  %2580 = vmatprep.mubr.msk.bf16.mxu0 %vm2790_vm1, %v2789_v9 }
 0x461   : > { %v1627_v56 = vpack.c.bf16 %v1623_v1, %v1623_v1  ;;  %2590 = vmatprep.subr.bf16.mxu0 %v2789_v9 }
 0x462   : > { %v2720_v2 = vpop.eup %2719 }
 0x463   : > { %v2722_v3 = vpop.eup %2721  ;;  %2575 = vmatmul.mubr.msk.bf16.vlgmr.msra.gmra.mrb[32].mxu1 %vm1387_vm2, %v1627_v56  ;;  %v1625_v6 = vmul.f32 %v2720_v2, %v2712_v43 }
 0x464   : > { %v1624_v5 = vmul.f32 %v2722_v3, %v2714_v44  ;;  %2585 = vmatpush3.bf16.msra.mxu1 %v1777_v57  ;;  %2586 = vmatprep.mubr.msk.bf16.mxu1 %vm2790_vm1, %v2789_v9 }
 0x465   : > { %2596 = vmatprep.subr.bf16.mxu1 %v2789_v9  ;;  %v1629_v10 = vpack.c.bf16 %v1625_v6, %v1625_v6  ;;  %v2699_v6 = vld [vmem:[%s3340_s14] sm:$0xff]  }
 0x466   : > { %v1628_v7 = vpack.c.bf16 %v1624_v5, %v1624_v5 }
 0x468   : > { %2581 = vmatmul.mubr.msk.bf16.vlgmr.msra.gmra.mrb[36].mxu0 %vm1387_vm2, %v1628_v7  ;;  %v2700_v7 = vld [vmem:[%s3340_s14 + $0x8] sm:$0xff]  }
 0x469   : > { %2591 = vmatpush3.bf16.msra.mxu0 %v1831_v8  ;;  %2592 = vmatprep.mubr.msk.bf16.mxu0 %vm2790_vm1, %v2789_v9  ;;  %v2702_v8 = vld [vmem:[%s3342_s16 + $0x8] sm:$0xff]  }
 0x46a   : > { %2602 = vmatprep.subr.bf16.mxu0 %v2789_v9 }
 0x46b   : > { %2587 = vmatmul.mubr.msk.bf16.vlgmr.msra.gmra.mrb[36].mxu1 %vm1387_vm2, %v1629_v10 }
 0x46c   : > { %2598 = vmatprep.mubr.msk.bf16.mxu1 %vm2790_vm1, %v2789_v9  ;;  %2597 = vmatpush3.bf16.msra.mxu1 %v1877_v12 }
 0x46d   : > { %2608 = vmatprep.subr.bf16.mxu1 %v2789_v9 }
 0x532   : > { %v1675_v14 = vpop.f32.mrb[32].mxu0 }
 0x533   : > { %v1819_v15 = vpack.c.bf16 %v1675_v14, %v1675_v14  ;;  %v2570_v16 = vpop.f32.mrb[33].mxu0  ;;  %v2362_v14 = vld [vmem:[%s3338_s12] ss:$0 sm:$0xff] }
 0x534   : > { %v1678_v18 = vpop.f32.mrb[34].mxu0  ;;  %v2363_v16 = vld [vmem:[%s3339_s13] ss:$0 sm:$0xff] }
 0x535   : > { %v2571_v20 = vpop.f32.mrb[35].mxu0  ;;  %2593 = vmatmul.mubr.msk.bf16.vlgmr.msra.gmra.mrb[40].mxu0 %vm1387_vm2, %v1819_v15 }
 0x536   : > { %v1721_v21 = vpop.f32.mrb[32].mxu1  ;;  %2603 = vmatpush3.bf16.msra.mxu0 %v1923_v17  ;;  %2604 = vmatprep.mubr.msk.bf16.mxu0 %vm2790_vm1, %v2789_v9  ;;  %v2703_v20 = vld [vmem:[%s3342_s16 + $0x10] sm:$0xff]  }
 0x537   : > { %v1820_v22 = vpack.c.bf16 %v1721_v21, %v1721_v21  ;;  %v2576_v23 = vpop.f32.mrb[33].mxu1  ;;  %2614 = vmatprep.subr.bf16.mxu0 %v2789_v9  ;;  %v2704_v21 = vld [vmem:[%s3342_s16 + $0x18] sm:$0xff]  }
 0x538   : > { %v1724_v25 = vpop.f32.mrb[34].mxu1 }
 0x539   : > { %v2577_v26 = vpop.f32.mrb[35].mxu1  ;;  %2599 = vmatmul.mubr.msk.bf16.vlgmr.msra.gmra.mrb[40].mxu1 %vm1387_vm2, %v1820_v22  ;;  %v2364_v22 = vld [vmem:[%s3341_s15] ss:$0 sm:$0xff] }
 0x53a   : > { %2609 = vmatpush3.bf16.msra.mxu1 %v1969_v24  ;;  %2610 = vmatprep.mubr.msk.bf16.mxu1 %vm2790_vm1, %v2789_v9 }
 0x53b   : > { %v1767_v27 = vpop.f32.mrb[36].mxu0  ;;  %2622 = vmatprep.subr.bf16.mxu1 %v2789_v9 }
 0x53c   : > { %v1821_v28 = vpack.c.bf16 %v1767_v27, %v1767_v27  ;;  %v2582_v29 = vpop.f32.mrb[37].mxu0 }
 0x53d   : > { %v1770_v30 = vpop.f32.mrb[38].mxu0 }
 0x53e   : > { %v2583_v31 = vpop.f32.mrb[39].mxu0  ;;  %2605 = vmatmul.mubr.msk.bf16.vlgmr.msra.gmra.mrb[44].mxu0 %vm1387_vm2, %v1821_v28  ;;  %v1813_v32 = vpop.f32.mrb[36].mxu1 }
 0x53f   : > { %v1822_v33 = vpack.c.bf16 %v1813_v32, %v1813_v32  ;;  %v2588_v34 = vpop.f32.mrb[37].mxu1  ;;  %2618 = vmatprep.mubr.msk.bf16.mxu0 %vm2790_vm1, %v2789_v9  ;;  %2615 = vmatpush3.bf16.msra.mxu0 %v2699_v6 }
 0x540   : > { %v1816_v35 = vpop.f32.mrb[38].mxu1  ;;  %2616 = vmatprep.subr.bf16.mxu0 %v2789_v9 }
 0x541   : > { %v2589_v36 = vpop.f32.mrb[39].mxu1  ;;  %2611 = vmatmul.mubr.msk.bf16.vlgmr.msra.gmra.mrb[44].mxu1 %vm1387_vm2, %v1822_v33 }
 0x542   : > { %2630 = vmatprep.mubr.msk.bf16.mxu1 %vm2790_vm1, %v2789_v9 }
 0x543   : > { %2617 = vmatpush3.bf16.msra.mxu0 %v2700_v7 }
 0x608   : > { %v1867_v37 = vpop.f32.mrb[40].mxu0 }
 0x609   : > { %v2594_v38 = vpop.f32.mrb[41].mxu0  ;;  %v2011_v42 = vsel %vm590_vm0, %v1867_v37, 0.0 }
 0x60a   : > { %v1870_v39 = vpop.f32.mrb[42].mxu0 }
 0x60b   : > { %v2595_v40 = vpop.f32.mrb[43].mxu0 }
 0x60c   : > { %v1913_v41 = vpop.f32.mrb[40].mxu1 }
 0x60d   : > { %v2012_v43 = vsel %vm590_vm0, %v1913_v41, 0.0  ;;  %v2600_v44 = vpop.f32.mrb[41].mxu1 }
 0x60e   : > { %v2013_v45 = vadd.f32 %v2012_v43, %v2011_v42  ;;  %v1916_v46 = vpop.f32.mrb[42].mxu1 }
 0x60f   : > { %v2601_v47 = vpop.f32.mrb[43].mxu1 }
 0x611   : > { %v1959_v48 = vpop.f32.mrb[44].mxu0 }
 0x612   : > { %v2014_v49 = vsel %vm590_vm0, %v1959_v48, 0.0  ;;  %v2606_v50 = vpop.f32.mrb[45].mxu0 }
 0x613   : > { %v2015_v51 = vadd.f32 %v2014_v49, %v2013_v45  ;;  %v1962_v52 = vpop.f32.mrb[46].mxu0 }
 0x614   : > { %v2607_v53 = vpop.f32.mrb[47].mxu0  ;;  %v2005_v54 = vpop.f32.mrb[44].mxu1 }
 0x615   : > { %v2016_v55 = vsel %vm590_vm0, %v2005_v54, 0.0  ;;  %v2612_v59 = vpop.f32.mrb[45].mxu1 }
 0x616   : > { %v2017_v60 = vadd.f32 %v2016_v55, %v2015_v51  ;;  %v2008_v61 = vpop.f32.mrb[46].mxu1 }
 0x617   : > { %v2613_v62 = vpop.f32.mrb[47].mxu1 }
 0x618   : > { %v2025_v63 = vadd.f32 %v2361_v58, %v2017_v60 }
 0x61a   : > { %v2026_v1 = vadd.f32 %v2025_v63, %v2943_v0  ;;  %v2701_v0 = vld [vmem:[%s3342_s16] sm:$0xff]  }
 0x61b   : > { %2623 = vmatpush3.bf16.msra.mxu1 %v2701_v0 }
 0x61c   : > { %v2029_v56 = vsel %vm590_vm0, %v2026_v1, 0.0  ;;  %2624 = vmatprep.subr.bf16.mxu1 %v2789_v9 }
 0x61d   : > { %2030 = vadd.xlane.f32.xlu0 %v2029_v56 }
 0x61f   : > { %2625 = vmatpush3.bf16.msra.mxu1 %v2702_v8 }
 0x620   : > { %2626 = vmatprep.subr.bf16.mxu1 %v2789_v9 }
 0x623   : > { %2627 = vmatpush3.bf16.msra.mxu1 %v2703_v20 }
 0x624   : > { %2628 = vmatprep.subr.bf16.mxu1 %v2789_v9  ;;  %v2368_v9 = vld [vmem:[%s3343_s17] ss:$0 sm:$0xff] }
 0x627   : > { %2629 = vmatpush3.bf16.msra.mxu1 %v2704_v21 }
 0x6aa   : > { %v2031_v2 = vpop.xlane.xlu0 %2030 }
 0x6ab   : > { %v2032_v3 = vmul.f32 0.03125, %v2031_v2 }
 0x6ad   : > { %v2033_v57 = vsub.f32 %v2026_v1, %v2032_v3 }
 0x6af   : > { %v2034_v4 = vmul.f32 %v2033_v57, %v2033_v57 }
 0x6b1   : > { %v2035_v5 = vsel %vm590_vm0, %v2034_v4, 0.0 }
 0x6b2   : > { %2036 = vadd.xlane.f32.xlu1 %v2035_v5 }
 0x73f   : > { %v2037_v10 = vpop.xlane.xlu1 %2036 }
 0x740   : > { %v2038_v11 = vmul.f32 0.03125, %v2037_v10 }
 0x742   : > { %v2039_v12 = vadd.f32 1e-05, %v2038_v11 }
 0x744   : > { %2723 = vrsqrt.f32 %v2039_v12 }
 0x74e   : > { %v2724_v13 = vpop.eup %2723 }
 0x74f   : > { %v2041_v15 = vmul.f32 %v2724_v13, %v2033_v57 }
 0x751   : > { %v2048_v17 = vmul.f32 %v2362_v14, %v2041_v15 }
 0x753   : > { %v2055_v18 = vadd.f32 %v2363_v16, %v2048_v17 }
 0x755   : > { %v2056_v19 = vpack.c.bf16 %v2055_v18, %v2055_v18 }
 0x757   : > { %2619 = vmatmul.mubr.msk.bf16.vlgmr.msra.gmra.mrb[48].mxu0 %vm590_vm0, %v2056_v19 }
 0x82a   : > { %v2117_v23 = vpop.f32.mrb[48].mxu0 }
 0x82b   : > { %v2118_v24 = vadd.f32 %v2364_v22, %v2117_v23  ;;  %v2620_v25 = vpop.f32.mrb[49].mxu0 }
 0x82c   : > { %v2120_v26 = vpop.f32.mrb[50].mxu0 }
 0x82d   : > { %v2123_v27 = vmax.f32 %v2118_v24, 0.0  ;;  %v2621_v28 = vpop.f32.mrb[51].mxu0 }
 0x82f   : > { %v2124_v29 = vpack.c.bf16 %v2123_v27, %v2123_v27 }
 0x831   : > { %2631 = vmatmul.mubr.msk.bf16.vlgmr.msra.gmra.mrb[48].mxu1 %vm2164_vm4, %v2124_v29 }
 0x904   : > { %v2202_v30 = vpop.f32.mrb[48].mxu1 }
 0x905   : > { %v2203_v31 = vadd.f32 %v2368_v9, %v2202_v30  ;;  %v2632_v32 = vpop.f32.mrb[49].mxu1 }
 0x906   : > { %v2205_v33 = vpop.f32.mrb[50].mxu1 }
 0x907   : > { %v2208_v34 = vadd.f32 %v2203_v31, %v2026_v1  ;;  %v2633_v35 = vpop.f32.mrb[51].mxu1 }
 0x909   : > { %2209 = vst.msk [vmem:[%s577_s19] sm:$0xff] %vm590_vm0, %v2208_v34 }
 0x90a   : > { %2738 = shalt.err (!%p2735_p3)
}
 0x90b   : > { %s2739_s29 = scalar_lea.hbm %s3283_s20, 128  ;;  %s2743_s23 = scalar_lea.hbm %s3344_s18, 256 }
 0x90c   : > { %p2740_p4 = scmp.ne.s32.totalorder %s3283_s20, %s2739_s29  ;;  %p2744_p9 = scmp.lt.u32.totalorder %s3283_s20, %s3344_s18 }
 0x90d   : > { %p2745_p10 = scmp.lt.u32.totalorder %s2743_s23, %s2739_s29  ;;  %p2747_p12 = scmp.lt.u32.totalorder %s2739_s29, %s3283_s20 }
 0x90e   : > { %p2741_p7 = pnand %p2740_p4, %p2925_p5 }
 0x90f   : > { %p2746_p11 = por %p2745_p10, %p2744_p9 }
 0x910   : > { %p2742_p8 = pneg %p2741_p7 }
 0x911   : > { %p2748_p13 = por %p2747_p12, %p2746_p11 }
 0x913   : > { %p2749_p0 = pnand %p2748_p13, %p2742_p8 }
 0x915   : > { %2752 = shalt.err (!%p2749_p0)
}
 0x916   : > { %2634 = dma.vmem_to_hbm [thread:$0]  (%p2925_p5), %s3285_s1, 128, %s3283_s20, %s2211_s0  }
 0x917 PF: > { %p2640_p1 = scmp.ge.s32.totalorder %s2787_s30, 2  ;;  %s2236_s22 = sand.u32 1, %s2775_s27  }
 0x918   : > { %s2237_s26 = scalar_lea.sflag [#allocation3], %s2236_s22 }
 0x919   : > { %p2637_p2 = pnand %p2640_p1, %p2929_p6 }
 0x91b   : > { %2770 = dma.done.wait (!%p2637_p2), %s2237_s26, 128  }
 0x91c   : > { %2772 = vsyncadd (!%p2637_p2), %s2237_s26, 4294967168  ;;  %s3364_s30 = sld [smem:[#allocation6_spill]]  ;;  %s3365_s29 = sld [smem:[#allocation5_spill]] }
 0x91d   : > { %s3366_s25 = sld [smem:[#allocation7_spill]]  ;;  %s3367_s27 = smov %s2779_s28 }
 0x922   : > { %p28_p3 = scmp.ge.s32.totalorder %s3364_s30, 4   ;;  %s3368_s28 = smov %s3365_s29 }
 0x923   : > { %s3369_s29 = smov %s3366_s25 }
 0x924   :  { %30 = sbr.rel (!%p28_p3) target bundleno = 8 (0x8), region = 130 }
 0x92b   :  { %2242 = vsyncpa [#allocation3], 1 }
 0x92c   :  { %2244 = vsyncpa [#allocation3 + $0x1], 1 }

</bundles_post_ra>
